<compile_context>
chip_gen: v5e
topology: v5e:2x2
jax: 0.10.0
libtpu: 0.0.40
codegen_flags: <defaults>
</compile_context>

<pallas_src>
import functools

import jax
import jax.numpy as jnp
from jax.experimental import pallas as pl
from jax.experimental.pallas import tpu as pltpu


_VMEM_LIMIT_BYTES = 64 * 1024 * 1024          # explicit scoped-VMEM cap (v5e default is 16 MiB)
_MAX_RESIDENT_WEIGHT_BYTES = 16 * 1024 * 1024  # collapsed-K path if weight fits comfortably


# ----------------------------------------------------------------------------
# Pallas kernels
# ----------------------------------------------------------------------------
def _gemm_shift_lrelu_kernel(x_ref, w_ref, shift_ref, o_ref, *, slope):
    """Single-K-step fused GEMM: (tm,K)@(K,Cout) + shift -> LeakyReLU -> store.

    No accumulator scratch / pl.when phases needed: the whole K contraction is
    one MXU call because the weight block is VMEM-resident.
    """
    y = jnp.dot(x_ref[...], w_ref[...], preferred_element_type=jnp.float32)
    y = y + shift_ref[...]
    y = jnp.where(y >= 0.0, y, slope * y)
    o_ref[...] = y.astype(o_ref.dtype)


def _gemm_shift_lrelu_acc_kernel(x_ref, w_ref, shift_ref, o_ref, acc_ref, *,
                                 slope):
    """Fallback tiled-K kernel (f32 VMEM accumulator) for oversized weights."""
    k = pl.program_id(2)

    @pl.when(k == 0)
    def _():
        acc_ref[...] = jnp.zeros_like(acc_ref)

    acc_ref[...] += jnp.dot(x_ref[...], w_ref[...],
                            preferred_element_type=jnp.float32)

    @pl.when(k == pl.num_programs(2) - 1)
    def _():
        y = acc_ref[...] + shift_ref[...]
        o_ref[...] = jnp.where(y >= 0.0, y, slope * y).astype(o_ref.dtype)


# ----------------------------------------------------------------------------
# Tile selection
# ----------------------------------------------------------------------------
def _pick_tm(M):
    """Largest sublane-aligned divisor <= 256 giving >= 2 i-tiles (megacore)."""
    if M <= 8 or M % 8 != 0:
        return M                      # full extent (always legal)
    for c in (256, 128, 64, 32, 16, 8):
        if c <= M // 2 and M % c == 0:
            return c
    return M


def _pick_div(dim, candidates):
    for c in candidates:
        if dim % c == 0:
            return c
    return dim


# ----------------------------------------------------------------------------
# Fused Conv-as-GEMM + (folded-BN) shift + LeakyReLU
# ----------------------------------------------------------------------------
def fused_conv_gemm(cols, w_mat, shift, slope, out_dtype=jnp.bfloat16):
    """cols: (M, K) bf16, w_mat: (K, Cout) bf16 (BN scale pre-folded),
    shift: (1, Cout) f32.  Returns LeakyReLU(cols @ w_mat + shift, slope)."""
    M, K = cols.shape
    K2, Cout = w_mat.shape
    assert K2 == K
    out_bytes = jnp.dtype(out_dtype).itemsize
    weight_bytes = K * Cout * w_mat.dtype.itemsize

    tm = _pick_tm(M)

    if weight_bytes <= _MAX_RESIDENT_WEIGHT_BYTES:
        # Weight-resident path: whole (K, Cout) weight lives in VMEM, K-grid
        # collapses to one step, weights DMA'd once (constant index map).
        cost = pl.CostEstimate(
            flops=2 * M * K * Cout,
            transcendentals=0,
            bytes_accessed=(M * K * cols.dtype.itemsize + weight_bytes
                            + M * Cout * out_bytes + Cout * 4),
        )
        return pl.pallas_call(
            functools.partial(_gemm_shift_lrelu_kernel, slope=slope),
            out_shape=jax.ShapeDtypeStruct((M, Cout), out_dtype),
            grid_spec=pltpu.PrefetchScalarGridSpec(
                num_scalar_prefetch=0,
                grid=(M // tm,),
                in_specs=[
                    pl.BlockSpec((tm, K), lambda i: (i, 0)),
                    pl.BlockSpec((K, Cout), lambda i: (0, 0)),
                    pl.BlockSpec((1, Cout), lambda i: (0, 0)),
                ],
                out_specs=pl.BlockSpec((tm, Cout), lambda i: (i, 0)),
            ),
            compiler_params=pltpu.CompilerParams(
                dimension_semantics=("parallel",),
                vmem_limit_bytes=_VMEM_LIMIT_BYTES),
            cost_estimate=cost,
        )(cols, w_mat, shift)

    # ---- Fallback: tiled K with f32 accumulator (weight too big for VMEM) ----
    tn = _pick_div(Cout, (256, 128)) if Cout % 128 == 0 else Cout
    tk = _pick_div(K, (2048, 1024, 512, 256, 128)) if K % 128 == 0 else K
    grid = (M // tm, Cout // tn, K // tk)
    cost = pl.CostEstimate(
        flops=2 * M * K * Cout,
        transcendentals=0,
        bytes_accessed=((M // tm) * weight_bytes                 # weights re-streamed per i-block
                        + (Cout // tn) * M * K * cols.dtype.itemsize
                        + M * Cout * out_bytes + Cout * 4),
    )
    return pl.pallas_call(
        functools.partial(_gemm_shift_lrelu_acc_kernel, slope=slope),
        out_shape=jax.ShapeDtypeStruct((M, Cout), out_dtype),
        grid_spec=pltpu.PrefetchScalarGridSpec(
            num_scalar_prefetch=0,
            grid=grid,
            in_specs=[
                pl.BlockSpec((tm, tk), lambda i, j, k: (i, k)),
                pl.BlockSpec((tk, tn), lambda i, j, k: (k, j)),
                pl.BlockSpec((1, tn), lambda i, j, k: (0, j)),
            ],
            out_specs=pl.BlockSpec((tm, tn), lambda i, j, k: (i, j)),
            scratch_shapes=[pltpu.VMEM((tm, tn), jnp.float32)],
        ),
        compiler_params=pltpu.CompilerParams(
            dimension_semantics=("parallel", "parallel", "arbitrary"),
            vmem_limit_bytes=_VMEM_LIMIT_BYTES),
        cost_estimate=cost,
    )(cols, w_mat, shift)


# ----------------------------------------------------------------------------
# im2col glue (plain JAX, NHWC, fused by XLA under jit)
# ----------------------------------------------------------------------------
def _im2col_nhwc(x, kh, kw, stride, pad):
    """x: (N, H, W, C) -> cols (N*Ho*Wo, kh*kw*C) with (kh, kw, C) K-order."""
    if pad > 0:
        x = jnp.pad(x, ((0, 0), (pad, pad), (pad, pad), (0, 0)))
    N, H, W, C = x.shape
    Ho = (H - kh) // stride + 1
    Wo = (W - kw) // stride + 1
    patches = []
    for i in range(kh):
        for j in range(kw):
            patches.append(
                x[:, i:i + stride * Ho:stride, j:j + stride * Wo:stride, :])
    cols = jnp.stack(patches, axis=3)                  # (N, Ho, Wo, kh*kw, C)
    return cols.reshape(N * Ho * Wo, kh * kw * C), Ho, Wo


# ----------------------------------------------------------------------------
# Discriminator: parameters + forward
# ----------------------------------------------------------------------------
def make_discriminator_params(key, ndf):
    """PyTorch-style parameters (OIHW conv weights, eval-mode BN stats)."""
    chans = [1, ndf, ndf * 2, ndf * 4, ndf * 8, 1]
    params = {}
    keys = jax.random.split(key, 18)
    ki = 0
    for li in range(5):
        cout, cin = chans[li + 1], chans[li]
        params[f"w{li + 1}"] = 0.02 * jax.random.normal(
            keys[ki], (cout, cin, 4, 4), jnp.float32)
        ki += 1
    params["b5"] = 0.02 * jax.random.normal(keys[ki], (1,), jnp.float32)
    ki += 1
    eps = 1e-5
    for li, c in [(2, ndf * 2), (3, ndf * 4), (4, ndf * 8)]:
        gamma = 1.0 + 0.1 * jax.random.normal(keys[ki], (c,), jnp.float32); ki += 1
        beta = 0.1 * jax.random.normal(keys[ki], (c,), jnp.float32); ki += 1
        rmean = 0.1 * jax.random.normal(keys[ki], (c,), jnp.float32); ki += 1
        rvar = 1.0 + 0.5 * jax.random.uniform(keys[ki], (c,), jnp.float32); ki += 1
        scale = gamma / jnp.sqrt(rvar + eps)
        params[f"bn{li}_scale"] = scale
        params[f"bn{li}_shift"] = beta - rmean * scale
    return params


def prepare_inference_params(params):
    """GEMM-ready bf16 (K, Cout) weights with BN scale folded in, f32 shifts."""
    specs = [
        ("w1", None, None),
        ("w2", "bn2_scale", "bn2_shift"),
        ("w3", "bn3_scale", "bn3_shift"),
        ("w4", "bn4_scale", "bn4_shift"),
        ("w5", None, "b5"),
    ]
    gemm_params = []
    for wname, sname, bname in specs:
        w = params[wname]                               # (Cout, Cin, kh, kw)
        cout, cin, kh, kw = w.shape
        # (kh, kw, Cin, Cout) flattening to match the im2col K-order.
        w_mat = w.transpose(2, 3, 1, 0).reshape(kh * kw * cin, cout)
        if sname is not None:                           # fold BN scale into W
            w_mat = w_mat * params[sname][None, :]
        shift = params[bname] if bname is not None else jnp.zeros(
            (cout,), jnp.float32)
        gemm_params.append((w_mat.astype(jnp.bfloat16),
                            shift.reshape(1, cout).astype(jnp.float32)))
    return tuple(gemm_params)


@jax.jit
def discriminator_forward(x, gemm_params):
    """x: (N, 1, H, W) f32 NCHW (PyTorch layout) -> (N, 1) f32."""
    (w1, s1), (w2, s2), (w3, s3), (w4, s4), (w5, b5) = gemm_params
    n = x.shape[0]

    h = jnp.transpose(x, (0, 2, 3, 1)).astype(jnp.bfloat16)   # NCHW -> NHWC once

    # Layer 1: Conv(1, ndf) + LeakyReLU.  K=16 / Cout=ndf starves the MXU
    # (masked lane stores, <=12% contraction depth), so it stays in XLA as an
    # im2col + small dot (per perf review).
    cols, ho, wo = _im2col_nhwc(h, 4, 4, 2, 1)
    y = jnp.dot(cols, w1, preferred_element_type=jnp.float32) + s1
    y = jnp.where(y >= 0.0, y, 0.2 * y)
    h = y.astype(jnp.bfloat16).reshape(n, ho, wo, -1)

    # Layers 2-4: fused Pallas GEMM (weight-resident, K-grid collapsed),
    # BN scale folded into the bf16 weights, shift + LeakyReLU in the epilogue,
    # bf16 activations out.
    for w_mat, shift in ((w2, s2), (w3, s3), (w4, s4)):
        cols, ho, wo = _im2col_nhwc(h, 4, 4, 2, 1)
        out = fused_conv_gemm(cols, w_mat, shift, slope=0.2,
                              out_dtype=jnp.bfloat16)          # (n*ho*wo, Cout)
        h = out.reshape(n, ho, wo, -1)                          # stays NHWC

    # Layer 5: Conv(8ndf, 1, 4, 1, 0, bias) -> 1x1.  Cout=1 would use a single
    # MXU output lane, so it is a plain row-reduction dot (per perf review).
    cols, _, _ = _im2col_nhwc(h, 4, 4, 1, 0)
    y = jnp.dot(cols, w5, preferred_element_type=jnp.float32) + b5
    return y.reshape(-1, 1)                                     # x.view(-1, 1)


# ----------------------------------------------------------------------------
# Pure-JAX reference (lax.conv, f32 HIGHEST) for correctness check
# ----------------------------------------------------------------------------
def discriminator_reference(x, params):
    def conv(x, w, stride, pad, bias=None):
        y = jax.lax.conv_general_dilated(
            x, w, (stride, stride), [(pad, pad), (pad, pad)],
            dimension_numbers=("NCHW", "OIHW", "NCHW"),
            precision=jax.lax.Precision.HIGHEST)
        if bias is not None:
            y = y + bias.reshape(1, -1, 1, 1)
        return y

    def bn(x, scale, shift):
        return x * scale.reshape(1, -1, 1, 1) + shift.reshape(1, -1, 1, 1)

    lrelu = lambda x: jnp.where(x >= 0, x, 0.2 * x)

    h = lrelu(conv(x, params["w1"], 2, 1))
    h = lrelu(bn(conv(h, params["w2"], 2, 1),
                 params["bn2_scale"], params["bn2_shift"]))
    h = lrelu(bn(conv(h, params["w3"], 2, 1),
                 params["bn3_scale"], params["bn3_shift"]))
    h = lrelu(bn(conv(h, params["w4"], 2, 1),
                 params["bn4_scale"], params["bn4_shift"]))
    h = conv(h, params["w5"], 1, 0, bias=params["b5"])
    return h.reshape(-1, 1)


if __name__ == "__main__":
    ndf = 8       # small ndf for the example (module default is 64)
    batch = 2
    key = jax.random.PRNGKey(0)
    k_x, k_p = jax.random.split(key)

    # DCGAN discriminator expects 64x64 single-channel input -> 1x1 output.
    x = jax.random.uniform(k_x, (batch, 1, 64, 64), jnp.float32,
                           minval=-1.0, maxval=1.0)
    params = make_discriminator_params(k_p, ndf)
    gemm_params = prepare_inference_params(params)

    out = jax.block_until_ready(discriminator_forward(x, gemm_params))
    assert out.shape == (batch, 1), out.shape

    ref = jax.block_until_ready(discriminator_reference(x, params))
    # bf16 matmul inputs + bf16 inter-layer activations + BN scale folded into
    # bf16 weights (f32 accumulation throughout) -> loose tolerance vs the f32
    # HIGHEST-precision reference.
    if not jnp.allclose(out, ref, rtol=5e-2, atol=1e-2):
        raise AssertionError(
            f"mismatch: max abs err {float(jnp.max(jnp.abs(out - ref)))}")

    print("KERNEL_OK")
</pallas_src>

<mosaic_0001>
module attributes {stable_mosaic.version = 11 : i64} {
  func.func @_gemm_shift_lrelu_kernel(%arg0: i32, %arg1: memref<256x128xbf16, #tpu.memory_space<vmem>>, %arg2: memref<128x16xbf16, #tpu.memory_space<vmem>>, %arg3: memref<1x16xf32, #tpu.memory_space<vmem>>, %arg4: memref<256x16xbf16, #tpu.memory_space<vmem>>) attributes {dimension_semantics = [#tpu.dimension_semantics<parallel>], iteration_bounds = array<i64: 2>, scalar_prefetch = 0 : i64, scratch_operands = 0 : i64, tpu.core_type = #tpu.core_type<tc>, window_params = [{transform_indices = @transform_0, window_bounds = array<i64: 256, 128>}, {pipeline_mode = #tpu.pipeline_mode<synchronous>, transform_indices = @transform_1, window_bounds = array<i64: 128, 16>}, {pipeline_mode = #tpu.pipeline_mode<synchronous>, transform_indices = @transform_2, window_bounds = array<i64: 1, 16>}, {transform_indices = @transform_3, window_bounds = array<i64: 256, 16>}]} {
    %c0 = arith.constant 0 : index
    %c0_0 = arith.constant 0 : index
    %0 = vector.load %arg1[%c0, %c0_0] : memref<256x128xbf16, #tpu.memory_space<vmem>>, vector<256x128xbf16>
    %c0_1 = arith.constant 0 : index
    %c0_2 = arith.constant 0 : index
    %1 = vector.load %arg2[%c0_1, %c0_2] : memref<128x16xbf16, #tpu.memory_space<vmem>>, vector<128x16xbf16>
    %cst = arith.constant dense<0.000000e+00> : vector<256x16xf32>
    %2 = tpu.matmul %0, %1, %cst {dimension_numbers = #tpu.dot_dimension_numbers<[1], [0], [0], [1], [0, 0, 1, 1], [], []>} : vector<256x128xbf16>, vector<128x16xbf16>, vector<256x16xf32> -> vector<256x16xf32>
    %c0_3 = arith.constant 0 : index
    %c0_4 = arith.constant 0 : index
    %3 = vector.load %arg3[%c0_3, %c0_4] : memref<1x16xf32, #tpu.memory_space<vmem>>, vector<1x16xf32>
    %4 = vector.broadcast %3 : vector<1x16xf32> to vector<256x16xf32>
    %5 = arith.addf %2, %4 : vector<256x16xf32>
    %cst_5 = arith.constant 0.000000e+00 : f32
    %6 = vector.broadcast %cst_5 : f32 to vector<256x16xf32>
    %7 = arith.cmpf oge, %5, %6 : vector<256x16xf32>
    %cst_6 = arith.constant 2.000000e-01 : f32
    %8 = vector.broadcast %cst_6 : f32 to vector<256x16xf32>
    %9 = arith.mulf %8, %5 : vector<256x16xf32>
    %10 = arith.select %7, %5, %9 : vector<256x16xi1>, vector<256x16xf32>
    %11 = arith.truncf %10 : vector<256x16xf32> to vector<256x16xbf16>
    %c0_7 = arith.constant 0 : index
    %c0_8 = arith.constant 0 : index
    %12 = vector.load %arg4[%c0_7, %c0_8] : memref<256x16xbf16, #tpu.memory_space<vmem>>, vector<256x16xbf16>
    tpu.vector_store %arg4[%c0_7, %c0_8], %11 {strides = array<i32>} : memref<256x16xbf16, #tpu.memory_space<vmem>>, vector<256x16xbf16>,
    return
  }
  func.func @transform_0(%arg0: i32) -> (i32, i32) {
    %c0_i32 = arith.constant 0 : i32
    %c0_i32_0 = arith.constant 0 : i32
    return %arg0, %c0_i32 : i32, i32
  }
  func.func @transform_1(%arg0: i32) -> (i32, i32) {
    %c0_i32 = arith.constant 0 : i32
    %c0_i32_0 = arith.constant 0 : i32
    %c0_i32_1 = arith.constant 0 : i32
    return %c0_i32, %c0_i32_0 : i32, i32
  }
  func.func @transform_2(%arg0: i32) -> (i32, i32) {
    %c0_i32 = arith.constant 0 : i32
    %c0_i32_0 = arith.constant 0 : i32
    %c0_i32_1 = arith.constant 0 : i32
    return %c0_i32, %c0_i32_0 : i32, i32
  }
  func.func @transform_3(%arg0: i32) -> (i32, i32) {
    %c0_i32 = arith.constant 0 : i32
    %c0_i32_0 = arith.constant 0 : i32
    return %arg0, %c0_i32 : i32, i32
  }
}

module attributes {stable_mosaic.version = 11 : i64} {
  func.func @_gemm_shift_lrelu_kernel(%arg0: i32, %arg1: memref<64x256xbf16, #tpu.memory_space<vmem>>, %arg2: memref<256x32xbf16, #tpu.memory_space<vmem>>, %arg3: memref<1x32xf32, #tpu.memory_space<vmem>>, %arg4: memref<64x32xbf16, #tpu.memory_space<vmem>>) attributes {dimension_semantics = [#tpu.dimension_semantics<parallel>], iteration_bounds = array<i64: 2>, scalar_prefetch = 0 : i64, scratch_operands = 0 : i64, tpu.core_type = #tpu.core_type<tc>, window_params = [{transform_indices = @transform_0, window_bounds = array<i64: 64, 256>}, {pipeline_mode = #tpu.pipeline_mode<synchronous>, transform_indices = @transform_1, window_bounds = array<i64: 256, 32>}, {pipeline_mode = #tpu.pipeline_mode<synchronous>, transform_indices = @transform_2, window_bounds = array<i64: 1, 32>}, {transform_indices = @transform_3, window_bounds = array<i64: 64, 32>}]} {
    %c0 = arith.constant 0 : index
    %c0_0 = arith.constant 0 : index
    %0 = vector.load %arg1[%c0, %c0_0] : memref<64x256xbf16, #tpu.memory_space<vmem>>, vector<64x256xbf16>
    %c0_1 = arith.constant 0 : index
    %c0_2 = arith.constant 0 : index
    %1 = vector.load %arg2[%c0_1, %c0_2] : memref<256x32xbf16, #tpu.memory_space<vmem>>, vector<256x32xbf16>
    %cst = arith.constant dense<0.000000e+00> : vector<64x32xf32>
    %2 = tpu.matmul %0, %1, %cst {dimension_numbers = #tpu.dot_dimension_numbers<[1], [0], [0], [1], [0, 0, 1, 1], [], []>} : vector<64x256xbf16>, vector<256x32xbf16>, vector<64x32xf32> -> vector<64x32xf32>
    %c0_3 = arith.constant 0 : index
    %c0_4 = arith.constant 0 : index
    %3 = vector.load %arg3[%c0_3, %c0_4] : memref<1x32xf32, #tpu.memory_space<vmem>>, vector<1x32xf32>
    %4 = vector.broadcast %3 : vector<1x32xf32> to vector<64x32xf32>
    %5 = arith.addf %2, %4 : vector<64x32xf32>
    %cst_5 = arith.constant 0.000000e+00 : f32
    %6 = vector.broadcast %cst_5 : f32 to vector<64x32xf32>
    %7 = arith.cmpf oge, %5, %6 : vector<64x32xf32>
    %cst_6 = arith.constant 2.000000e-01 : f32
    %8 = vector.broadcast %cst_6 : f32 to vector<64x32xf32>
    %9 = arith.mulf %8, %5 : vector<64x32xf32>
    %10 = arith.select %7, %5, %9 : vector<64x32xi1>, vector<64x32xf32>
    %11 = arith.truncf %10 : vector<64x32xf32> to vector<64x32xbf16>
    %c0_7 = arith.constant 0 : index
    %c0_8 = arith.constant 0 : index
    %12 = vector.load %arg4[%c0_7, %c0_8] : memref<64x32xbf16, #tpu.memory_space<vmem>>, vector<64x32xbf16>
    tpu.vector_store %arg4[%c0_7, %c0_8], %11 {strides = array<i32>} : memref<64x32xbf16, #tpu.memory_space<vmem>>, vector<64x32xbf16>,
    return
  }
  func.func @transform_0(%arg0: i32) -> (i32, i32) {
    %c0_i32 = arith.constant 0 : i32
    %c0_i32_0 = arith.constant 0 : i32
    return %arg0, %c0_i32 : i32, i32
  }
  func.func @transform_1(%arg0: i32) -> (i32, i32) {
    %c0_i32 = arith.constant 0 : i32
    %c0_i32_0 = arith.constant 0 : i32
    %c0_i32_1 = arith.constant 0 : i32
    return %c0_i32, %c0_i32_0 : i32, i32
  }
  func.func @transform_2(%arg0: i32) -> (i32, i32) {
    %c0_i32 = arith.constant 0 : i32
    %c0_i32_0 = arith.constant 0 : i32
    %c0_i32_1 = arith.constant 0 : i32
    return %c0_i32, %c0_i32_0 : i32, i32
  }
  func.func @transform_3(%arg0: i32) -> (i32, i32) {
    %c0_i32 = arith.constant 0 : i32
    %c0_i32_0 = arith.constant 0 : i32
    return %arg0, %c0_i32 : i32, i32
  }
}

module attributes {stable_mosaic.version = 11 : i64} {
  func.func @_gemm_shift_lrelu_kernel(%arg0: i32, %arg1: memref<16x512xbf16, #tpu.memory_space<vmem>>, %arg2: memref<512x64xbf16, #tpu.memory_space<vmem>>, %arg3: memref<1x64xf32, #tpu.memory_space<vmem>>, %arg4: memref<16x64xbf16, #tpu.memory_space<vmem>>) attributes {dimension_semantics = [#tpu.dimension_semantics<parallel>], iteration_bounds = array<i64: 2>, scalar_prefetch = 0 : i64, scratch_operands = 0 : i64, tpu.core_type = #tpu.core_type<tc>, window_params = [{transform_indices = @transform_0, window_bounds = array<i64: 16, 512>}, {pipeline_mode = #tpu.pipeline_mode<synchronous>, transform_indices = @transform_1, window_bounds = array<i64: 512, 64>}, {pipeline_mode = #tpu.pipeline_mode<synchronous>, transform_indices = @transform_2, window_bounds = array<i64: 1, 64>}, {transform_indices = @transform_3, window_bounds = array<i64: 16, 64>}]} {
    %c0 = arith.constant 0 : index
    %c0_0 = arith.constant 0 : index
    %0 = vector.load %arg1[%c0, %c0_0] : memref<16x512xbf16, #tpu.memory_space<vmem>>, vector<16x512xbf16>
    %c0_1 = arith.constant 0 : index
    %c0_2 = arith.constant 0 : index
    %1 = vector.load %arg2[%c0_1, %c0_2] : memref<512x64xbf16, #tpu.memory_space<vmem>>, vector<512x64xbf16>
    %cst = arith.constant dense<0.000000e+00> : vector<16x64xf32>
    %2 = tpu.matmul %0, %1, %cst {dimension_numbers = #tpu.dot_dimension_numbers<[1], [0], [0], [1], [0, 0, 1, 1], [], []>} : vector<16x512xbf16>, vector<512x64xbf16>, vector<16x64xf32> -> vector<16x64xf32>
    %c0_3 = arith.constant 0 : index
    %c0_4 = arith.constant 0 : index
    %3 = vector.load %arg3[%c0_3, %c0_4] : memref<1x64xf32, #tpu.memory_space<vmem>>, vector<1x64xf32>
    %4 = vector.broadcast %3 : vector<1x64xf32> to vector<16x64xf32>
    %5 = arith.addf %2, %4 : vector<16x64xf32>
    %cst_5 = arith.constant 0.000000e+00 : f32
    %6 = vector.broadcast %cst_5 : f32 to vector<16x64xf32>
    %7 = arith.cmpf oge, %5, %6 : vector<16x64xf32>
    %cst_6 = arith.constant 2.000000e-01 : f32
    %8 = vector.broadcast %cst_6 : f32 to vector<16x64xf32>
    %9 = arith.mulf %8, %5 : vector<16x64xf32>
    %10 = arith.select %7, %5, %9 : vector<16x64xi1>, vector<16x64xf32>
    %11 = arith.truncf %10 : vector<16x64xf32> to vector<16x64xbf16>
    %c0_7 = arith.constant 0 : index
    %c0_8 = arith.constant 0 : index
    %12 = vector.load %arg4[%c0_7, %c0_8] : memref<16x64xbf16, #tpu.memory_space<vmem>>, vector<16x64xbf16>
    tpu.vector_store %arg4[%c0_7, %c0_8], %11 {strides = array<i32>} : memref<16x64xbf16, #tpu.memory_space<vmem>>, vector<16x64xbf16>,
    return
  }
  func.func @transform_0(%arg0: i32) -> (i32, i32) {
    %c0_i32 = arith.constant 0 : i32
    %c0_i32_0 = arith.constant 0 : i32
    return %arg0, %c0_i32 : i32, i32
  }
  func.func @transform_1(%arg0: i32) -> (i32, i32) {
    %c0_i32 = arith.constant 0 : i32
    %c0_i32_0 = arith.constant 0 : i32
    %c0_i32_1 = arith.constant 0 : i32
    return %c0_i32, %c0_i32_0 : i32, i32
  }
  func.func @transform_2(%arg0: i32) -> (i32, i32) {
    %c0_i32 = arith.constant 0 : i32
    %c0_i32_0 = arith.constant 0 : i32
    %c0_i32_1 = arith.constant 0 : i32
    return %c0_i32, %c0_i32_0 : i32, i32
  }
  func.func @transform_3(%arg0: i32) -> (i32, i32) {
    %c0_i32 = arith.constant 0 : i32
    %c0_i32_0 = arith.constant 0 : i32
    return %arg0, %c0_i32 : i32, i32
  }
}

</mosaic_0001>

<bundles_post_ra>
// kernel: discriminator_forward.3
= control target key start
LH: loop header
LB: loop body
LE: loop exit
PB: predicated region body
PF: predicated region fallthrough
CT: control target
= control target key end

     0   :  { %s868_s12 = smov 0   ;;  %s1037_s0 = inlined_call_operand.vmem [shape: bf16[512,128], index: 0, kind: input, shape index: {}]   ;;  %s1038_s1 = inlined_call_operand.vmem [shape: bf16[128,16], index: 1, kind: input, shape index: {}]   ;;  %s1039_s2 = inlined_call_operand.vmem [shape: f32[1,16], index: 2, kind: input, shape index: {}]   ;;  %s1040_s3 = inlined_call_operand.vmem [shape: bf16[512,16], index: 3, kind: output, shape index: {}]  }
   0x1 LB: > { %s676_s13 = sadd.s32 4294967295, %s846_s12   ;;  %p680_p0 = scmp.ge.s32.totalorder %s846_s12, 1  ;;  %s846_s12 = sphi %s868_s12, %s13_s12  }
   0x2   : > { %p138_p1 = scmp.lt.s32.totalorder %s846_s12, 3 }
   0x4   : > { %p139_p2 = pnand %p680_p0, %p138_p1 }
   0x5   : > { %s681_s22 = sshll.u32 (!%p139_p2), %s676_s13, 5 }
   0x6   : > { %142 = sbr.rel (%p139_p2) target bundleno = 241 (0xf1), region = 32  ;;  %p163_p3 = scmp.lt.s32.totalorder (!%p139_p2), %s681_s22, 63 }
   0xb   : > { %v806_v0 = vld [vmem:[%s1038_s1 + $0x38] sm:$0xff]  ;;  %v805_v1 = vld [vmem:[%s1038_s1 + $0x30] sm:$0xff]  ;;  %v804_v2 = vld [vmem:[%s1038_s1 + $0x28] sm:$0xff]  ;;  %s1042_s22 = smov (!%p163_p3, %s681_s22), 63  ;;  %vm587_vm2 = vcmask 125952  }
   0xc   : > { %370 = vmatpush.bf16.msra.mxu0 %v806_v0  ;;  %807 = vmatpush.bf16.msra.mxu1 %v806_v0  ;;  %v803_v3 = vld [vmem:[%s1038_s1 + $0x20] sm:$0xff]  ;;  %v802_v4 = vld [vmem:[%s1038_s1 + $0x18] sm:$0xff]  ;;  %v801_v5 = vld [vmem:[%s1038_s1 + $0x10] sm:$0xff]  ;;  %s682_s29 = sshll.u32 %s1042_s22, 2 }
   0xd   : > { %808 = vmatpush.bf16.msra.mxu2 %v806_v0  ;;  %809 = vmatpush.bf16.msra.mxu3 %v806_v0  ;;  %v800_v6 = vld [vmem:[%s1038_s1 + $0x8] sm:$0xff]  ;;  %v799_v7 = vld [vmem:[%s1038_s1] sm:$0xff]  ;;  %s908_s7 = scalar_lea.vmem %s1037_s0, %s682_s29  ;;  %s938_s13 = scalar_lea.vmem %s1040_s3, %s682_s29 }
   0xe   : > { %v783_v8 = vld [vmem:[%s908_s7] sm:$0xff]  ;;  %v784_v12 = vld [vmem:[%s908_s7 + $0x8] sm:$0xff]  ;;  %v785_v16 = vld [vmem:[%s908_s7 + $0x10] sm:$0xff] }
   0xf   : > { %v787_v9 = vld [vmem:[%s908_s7 + $0x20] sm:$0xff]  ;;  %v788_v13 = vld [vmem:[%s908_s7 + $0x28] sm:$0xff]  ;;  %v789_v17 = vld [vmem:[%s908_s7 + $0x30] sm:$0xff] }
  0x10   : > { %371 = vmatpush.bf16.msra.mxu0 %v805_v1  ;;  %810 = vmatpush.bf16.msra.mxu1 %v805_v1  ;;  %v791_v10 = vld [vmem:[%s908_s7 + $0x40] sm:$0xff]  ;;  %v792_v14 = vld [vmem:[%s908_s7 + $0x48] sm:$0xff]  ;;  %v793_v18 = vld [vmem:[%s908_s7 + $0x50] sm:$0xff] }
  0x11   : > { %811 = vmatpush.bf16.msra.mxu2 %v805_v1  ;;  %812 = vmatpush.bf16.msra.mxu3 %v805_v1  ;;  %v795_v11 = vld [vmem:[%s908_s7 + $0x60] sm:$0xff]  ;;  %v796_v15 = vld [vmem:[%s908_s7 + $0x68] sm:$0xff]  ;;  %v797_v19 = vld [vmem:[%s908_s7 + $0x70] sm:$0xff] }
  0x12   : > { %v786_v20 = vld [vmem:[%s908_s7 + $0x18] sm:$0xff]  ;;  %v929_v24 = vld [vmem:[%s1039_s2] ss:$0 sm:$0xff] }
  0x13   : > { %v790_v21 = vld [vmem:[%s908_s7 + $0x38] sm:$0xff] }
  0x14   : > { %372 = vmatpush.bf16.msra.mxu0 %v804_v2  ;;  %813 = vmatpush.bf16.msra.mxu1 %v804_v2  ;;  %v794_v22 = vld [vmem:[%s908_s7 + $0x58] sm:$0xff] }
  0x15   : > { %814 = vmatpush.bf16.msra.mxu2 %v804_v2  ;;  %815 = vmatpush.bf16.msra.mxu3 %v804_v2  ;;  %v798_v23 = vld [vmem:[%s908_s7 + $0x78] sm:$0xff] }
  0x18   : > { %373 = vmatpush.bf16.msra.mxu0 %v803_v3  ;;  %816 = vmatpush.bf16.msra.mxu1 %v803_v3 }
  0x19   : > { %817 = vmatpush.bf16.msra.mxu2 %v803_v3  ;;  %818 = vmatpush.bf16.msra.mxu3 %v803_v3 }
  0x1c   : > { %374 = vmatpush.bf16.msra.mxu0 %v802_v4  ;;  %819 = vmatpush.bf16.msra.mxu1 %v802_v4 }
  0x1d   : > { %820 = vmatpush.bf16.msra.mxu2 %v802_v4  ;;  %821 = vmatpush.bf16.msra.mxu3 %v802_v4 }
  0x20   : > { %375 = vmatpush.bf16.msra.mxu0 %v801_v5  ;;  %822 = vmatpush.bf16.msra.mxu1 %v801_v5 }
  0x21   : > { %823 = vmatpush.bf16.msra.mxu2 %v801_v5  ;;  %824 = vmatpush.bf16.msra.mxu3 %v801_v5 }
  0x24   : > { %376 = vmatpush.bf16.msra.mxu0 %v800_v6  ;;  %825 = vmatpush.bf16.msra.mxu1 %v800_v6 }
  0x25   : > { %826 = vmatpush.bf16.msra.mxu2 %v800_v6  ;;  %827 = vmatpush.bf16.msra.mxu3 %v800_v6 }
  0x28   : > { %377 = vmatpush.bf16.msra.mxu0 %v799_v7  ;;  %828 = vmatpush.bf16.msra.mxu1 %v799_v7 }
  0x29   : > { %829 = vmatpush.bf16.msra.mxu2 %v799_v7  ;;  %830 = vmatpush.bf16.msra.mxu3 %v799_v7 }
  0x2b   : > { %378 = vmatmul.bf16.vlgmr.msra.gmra.mxu0 %v783_v8  ;;  %398 = vmatmul.bf16.vlgmr.msra.gmra.mxu1 %v787_v9 }
  0x2c   : > { %418 = vmatmul.bf16.vlgmr.msra.gmra.mxu2 %v791_v10  ;;  %438 = vmatmul.bf16.vlgmr.msra.gmra.mxu3 %v795_v11 }
  0x3b   : > { %383 = vmatmul.bf16.gmra.mxu0 %v784_v12  ;;  %403 = vmatmul.bf16.gmra.mxu1 %v788_v13 }
  0x3c   : > { %423 = vmatmul.bf16.gmra.mxu2 %v792_v14  ;;  %443 = vmatmul.bf16.gmra.mxu3 %v796_v15 }
  0x4b   : > { %388 = vmatmul.bf16.gmra.mxu0 %v785_v16  ;;  %408 = vmatmul.bf16.gmra.mxu1 %v789_v17 }
  0x4c   : > { %428 = vmatmul.bf16.gmra.mxu2 %v793_v18  ;;  %448 = vmatmul.bf16.gmra.mxu3 %v797_v19 }
  0x5b   : > { %393 = vmatmul.bf16.gmra.mxu0 %v786_v20  ;;  %413 = vmatmul.bf16.gmra.mxu1 %v790_v21 }
  0x5c   : > { %433 = vmatmul.bf16.gmra.mxu2 %v794_v22  ;;  %453 = vmatmul.bf16.gmra.mxu3 %v798_v23 }
  0xa8   : > { %v379_v25 = vpop.f32.mrf.mxu0  ;;  %v399_v26 = vpop.f32.mrf.mxu1 }
  0xa9   : > { %v380_v27 = vadd.f32 %v929_v24, %v379_v25  ;;  %v400_v28 = vadd.f32 %v929_v24, %v399_v26 }
  0xab   : > { %vm459_vm0 = vcmp.ge.f32.partialorder %v380_v27, 0.0  ;;  %v491_v29 = vmul.f32 0.2, %v380_v27  ;;  %vm467_vm1 = vcmp.ge.f32.partialorder %v400_v28, 0.0  ;;  %v499_v30 = vmul.f32 0.2, %v400_v28 }
  0xad   : > { %v523_v31 = vsel %vm459_vm0, %v380_v27, %v491_v29  ;;  %v531_v32 = vsel %vm467_vm1, %v400_v28, %v499_v30 }
  0xae   : > { %v555_v33 = vpack.c.bf16 %v523_v31, %v523_v31  ;;  %v563_v34 = vpack.c.bf16 %v531_v32, %v531_v32 }
  0xaf   : > { %v419_v35 = vpop.f32.mrf.mxu2  ;;  %v439_v36 = vpop.f32.mrf.mxu3 }
  0xb0   : > { %588 = vst.msk [vmem:[%s938_s13] sm:$0xf] %vm587_vm2, %v555_v33  ;;  %v420_v37 = vadd.f32 %v929_v24, %v419_v35  ;;  %v440_v38 = vadd.f32 %v929_v24, %v439_v36  ;;  %v381_v39 = vpop.f32.mrf.mxu0  ;;  %v401_v40 = vpop.f32.mrf.mxu1 }
  0xb1   : > { %596 = vst.msk [vmem:[%s938_s13 + $0x20] sm:$0xf] %vm587_vm2, %v563_v34  ;;  %v382_v41 = vadd.f32 %v929_v24, %v381_v39  ;;  %v402_v42 = vadd.f32 %v929_v24, %v401_v40 }
  0xb2   : > { %vm475_vm3 = vcmp.ge.f32.partialorder %v420_v37, 0.0  ;;  %v507_v43 = vmul.f32 0.2, %v420_v37  ;;  %vm483_vm4 = vcmp.ge.f32.partialorder %v440_v38, 0.0  ;;  %v515_v44 = vmul.f32 0.2, %v440_v38 }
  0xb3   : > { %vm460_vm5 = vcmp.ge.f32.partialorder %v382_v41, 0.0  ;;  %v492_v45 = vmul.f32 0.2, %v382_v41  ;;  %vm468_vm6 = vcmp.ge.f32.partialorder %v402_v42, 0.0  ;;  %v500_v46 = vmul.f32 0.2, %v402_v42 }
  0xb4   : > { %v539_v47 = vsel %vm475_vm3, %v420_v37, %v507_v43  ;;  %v547_v48 = vsel %vm483_vm4, %v440_v38, %v515_v44 }
  0xb5   : > { %v571_v49 = vpack.c.bf16 %v539_v47, %v539_v47  ;;  %v579_v50 = vpack.c.bf16 %v547_v48, %v547_v48  ;;  %v524_v51 = vsel %vm460_vm5, %v382_v41, %v492_v45  ;;  %v532_v52 = vsel %vm468_vm6, %v402_v42, %v500_v46 }
  0xb6   : > { %v556_v53 = vpack.c.bf16 %v524_v51, %v524_v51  ;;  %v564_v54 = vpack.c.bf16 %v532_v52, %v532_v52 }
  0xb7   : > { %604 = vst.msk [vmem:[%s938_s13 + $0x40] sm:$0xf] %vm587_vm2, %v571_v49  ;;  %v421_v55 = vpop.f32.mrf.mxu2  ;;  %v441_v56 = vpop.f32.mrf.mxu3 }
  0xb8   : > { %612 = vst.msk [vmem:[%s938_s13 + $0x60] sm:$0xf] %vm587_vm2, %v579_v50  ;;  %v422_v57 = vadd.f32 %v929_v24, %v421_v55  ;;  %v442_v58 = vadd.f32 %v929_v24, %v441_v56  ;;  %v384_v59 = vpop.f32.mrf.mxu0  ;;  %v404_v60 = vpop.f32.mrf.mxu1 }
  0xb9   : > { %589 = vst.msk [vmem:[%s938_s13 + $0x4] sm:$0xf] %vm587_vm2, %v556_v53  ;;  %v385_v61 = vadd.f32 %v929_v24, %v384_v59  ;;  %v405_v62 = vadd.f32 %v929_v24, %v404_v60 }
  0xba   : > { %597 = vst.msk [vmem:[%s938_s13 + $0x24] sm:$0xf] %vm587_vm2, %v564_v54  ;;  %vm476_vm7 = vcmp.ge.f32.partialorder %v422_v57, 0.0  ;;  %v508_v63 = vmul.f32 0.2, %v422_v57  ;;  %vm484_vm8 = vcmp.ge.f32.partialorder %v442_v58, 0.0 }
  0xbb   : > { %v516_v0 = vmul.f32 0.2, %v442_v58  ;;  %vm461_vm9 = vcmp.ge.f32.partialorder %v385_v61, 0.0  ;;  %v493_v1 = vmul.f32 0.2, %v385_v61  ;;  %vm469_vm10 = vcmp.ge.f32.partialorder %v405_v62, 0.0 }
  0xbc   : > { %v540_v2 = vsel %vm476_vm7, %v422_v57, %v508_v63  ;;  %v501_v3 = vmul.f32 0.2, %v405_v62 }
  0xbd   : > { %v572_v4 = vpack.c.bf16 %v540_v2, %v540_v2  ;;  %v548_v5 = vsel %vm484_vm8, %v442_v58, %v516_v0  ;;  %v525_v6 = vsel %vm461_vm9, %v385_v61, %v493_v1 }
  0xbe   : > { %v580_v7 = vpack.c.bf16 %v548_v5, %v548_v5  ;;  %v557_v8 = vpack.c.bf16 %v525_v6, %v525_v6  ;;  %v533_v9 = vsel %vm469_vm10, %v405_v62, %v501_v3 }
  0xbf   : > { %605 = vst.msk [vmem:[%s938_s13 + $0x44] sm:$0xf] %vm587_vm2, %v572_v4  ;;  %v565_v10 = vpack.c.bf16 %v533_v9, %v533_v9  ;;  %v424_v11 = vpop.f32.mrf.mxu2  ;;  %v444_v12 = vpop.f32.mrf.mxu3 }
  0xc0   : > { %613 = vst.msk [vmem:[%s938_s13 + $0x64] sm:$0xf] %vm587_vm2, %v580_v7  ;;  %v425_v13 = vadd.f32 %v929_v24, %v424_v11  ;;  %v445_v14 = vadd.f32 %v929_v24, %v444_v12  ;;  %v386_v15 = vpop.f32.mrf.mxu0  ;;  %v406_v16 = vpop.f32.mrf.mxu1 }
  0xc1   : > { %590 = vst.msk [vmem:[%s938_s13 + $0x8] sm:$0xf] %vm587_vm2, %v557_v8  ;;  %v387_v17 = vadd.f32 %v929_v24, %v386_v15  ;;  %v407_v18 = vadd.f32 %v929_v24, %v406_v16 }
  0xc2   : > { %598 = vst.msk [vmem:[%s938_s13 + $0x28] sm:$0xf] %vm587_vm2, %v565_v10  ;;  %vm477_vm11 = vcmp.ge.f32.partialorder %v425_v13, 0.0  ;;  %v509_v19 = vmul.f32 0.2, %v425_v13  ;;  %vm485_vm12 = vcmp.ge.f32.partialorder %v445_v14, 0.0 }
  0xc3   : > { %v517_v20 = vmul.f32 0.2, %v445_v14  ;;  %vm462_vm13 = vcmp.ge.f32.partialorder %v387_v17, 0.0  ;;  %v494_v21 = vmul.f32 0.2, %v387_v17  ;;  %vm470_vm14 = vcmp.ge.f32.partialorder %v407_v18, 0.0 }
  0xc4   : > { %v541_v22 = vsel %vm477_vm11, %v425_v13, %v509_v19  ;;  %v502_v23 = vmul.f32 0.2, %v407_v18 }
  0xc5   : > { %v573_v25 = vpack.c.bf16 %v541_v22, %v541_v22  ;;  %v549_v26 = vsel %vm485_vm12, %v445_v14, %v517_v20  ;;  %v526_v27 = vsel %vm462_vm13, %v387_v17, %v494_v21 }
  0xc6   : > { %v581_v28 = vpack.c.bf16 %v549_v26, %v549_v26  ;;  %v558_v29 = vpack.c.bf16 %v526_v27, %v526_v27  ;;  %v534_v30 = vsel %vm470_vm14, %v407_v18, %v502_v23 }
  0xc7   : > { %606 = vst.msk [vmem:[%s938_s13 + $0x48] sm:$0xf] %vm587_vm2, %v573_v25  ;;  %v566_v31 = vpack.c.bf16 %v534_v30, %v534_v30  ;;  %v426_v32 = vpop.f32.mrf.mxu2  ;;  %v446_v33 = vpop.f32.mrf.mxu3 }
  0xc8   : > { %614 = vst.msk [vmem:[%s938_s13 + $0x68] sm:$0xf] %vm587_vm2, %v581_v28  ;;  %v427_v34 = vadd.f32 %v929_v24, %v426_v32  ;;  %v447_v35 = vadd.f32 %v929_v24, %v446_v33  ;;  %v389_v36 = vpop.f32.mrf.mxu0  ;;  %v409_v37 = vpop.f32.mrf.mxu1 }
  0xc9   : > { %591 = vst.msk [vmem:[%s938_s13 + $0xc] sm:$0xf] %vm587_vm2, %v558_v29  ;;  %v390_v38 = vadd.f32 %v929_v24, %v389_v36  ;;  %v410_v39 = vadd.f32 %v929_v24, %v409_v37 }
  0xca   : > { %599 = vst.msk [vmem:[%s938_s13 + $0x2c] sm:$0xf] %vm587_vm2, %v566_v31  ;;  %vm478_vm15 = vcmp.ge.f32.partialorder %v427_v34, 0.0  ;;  %v510_v40 = vmul.f32 0.2, %v427_v34  ;;  %vm486_vm0 = vcmp.ge.f32.partialorder %v447_v35, 0.0 }
  0xcb   : > { %v518_v41 = vmul.f32 0.2, %v447_v35  ;;  %vm463_vm1 = vcmp.ge.f32.partialorder %v390_v38, 0.0  ;;  %v495_v42 = vmul.f32 0.2, %v390_v38  ;;  %vm471_vm3 = vcmp.ge.f32.partialorder %v410_v39, 0.0 }
  0xcc   : > { %v542_v43 = vsel %vm478_vm15, %v427_v34, %v510_v40  ;;  %v503_v44 = vmul.f32 0.2, %v410_v39 }
  0xcd   : > { %v574_v45 = vpack.c.bf16 %v542_v43, %v542_v43  ;;  %v550_v46 = vsel %vm486_vm0, %v447_v35, %v518_v41  ;;  %v527_v47 = vsel %vm463_vm1, %v390_v38, %v495_v42 }
  0xce   : > { %v582_v48 = vpack.c.bf16 %v550_v46, %v550_v46  ;;  %v559_v49 = vpack.c.bf16 %v527_v47, %v527_v47  ;;  %v535_v50 = vsel %vm471_vm3, %v410_v39, %v503_v44 }
  0xcf   : > { %607 = vst.msk [vmem:[%s938_s13 + $0x4c] sm:$0xf] %vm587_vm2, %v574_v45  ;;  %v567_v51 = vpack.c.bf16 %v535_v50, %v535_v50  ;;  %v429_v52 = vpop.f32.mrf.mxu2  ;;  %v449_v53 = vpop.f32.mrf.mxu3 }
  0xd0   : > { %615 = vst.msk [vmem:[%s938_s13 + $0x6c] sm:$0xf] %vm587_vm2, %v582_v48  ;;  %v430_v54 = vadd.f32 %v929_v24, %v429_v52  ;;  %v450_v55 = vadd.f32 %v929_v24, %v449_v53  ;;  %v391_v56 = vpop.f32.mrf.mxu0  ;;  %v411_v57 = vpop.f32.mrf.mxu1 }
  0xd1   : > { %592 = vst.msk [vmem:[%s938_s13 + $0x10] sm:$0xf] %vm587_vm2, %v559_v49  ;;  %v392_v58 = vadd.f32 %v929_v24, %v391_v56  ;;  %v412_v59 = vadd.f32 %v929_v24, %v411_v57 }
  0xd2   : > { %600 = vst.msk [vmem:[%s938_s13 + $0x30] sm:$0xf] %vm587_vm2, %v567_v51  ;;  %vm479_vm4 = vcmp.ge.f32.partialorder %v430_v54, 0.0  ;;  %v511_v60 = vmul.f32 0.2, %v430_v54  ;;  %vm487_vm5 = vcmp.ge.f32.partialorder %v450_v55, 0.0 }
  0xd3   : > { %v519_v61 = vmul.f32 0.2, %v450_v55  ;;  %vm464_vm6 = vcmp.ge.f32.partialorder %v392_v58, 0.0  ;;  %v496_v62 = vmul.f32 0.2, %v392_v58  ;;  %vm472_vm7 = vcmp.ge.f32.partialorder %v412_v59, 0.0 }
  0xd4   : > { %v543_v63 = vsel %vm479_vm4, %v430_v54, %v511_v60  ;;  %v504_v0 = vmul.f32 0.2, %v412_v59 }
  0xd5   : > { %v575_v1 = vpack.c.bf16 %v543_v63, %v543_v63  ;;  %v551_v2 = vsel %vm487_vm5, %v450_v55, %v519_v61  ;;  %v528_v3 = vsel %vm464_vm6, %v392_v58, %v496_v62 }
  0xd6   : > { %v583_v4 = vpack.c.bf16 %v551_v2, %v551_v2  ;;  %v560_v5 = vpack.c.bf16 %v528_v3, %v528_v3  ;;  %v536_v6 = vsel %vm472_vm7, %v412_v59, %v504_v0 }
  0xd7   : > { %608 = vst.msk [vmem:[%s938_s13 + $0x50] sm:$0xf] %vm587_vm2, %v575_v1  ;;  %v568_v7 = vpack.c.bf16 %v536_v6, %v536_v6  ;;  %v431_v8 = vpop.f32.mrf.mxu2  ;;  %v451_v9 = vpop.f32.mrf.mxu3 }
  0xd8   : > { %616 = vst.msk [vmem:[%s938_s13 + $0x70] sm:$0xf] %vm587_vm2, %v583_v4  ;;  %v432_v10 = vadd.f32 %v929_v24, %v431_v8  ;;  %v452_v11 = vadd.f32 %v929_v24, %v451_v9  ;;  %v394_v12 = vpop.f32.mrf.mxu0  ;;  %v414_v13 = vpop.f32.mrf.mxu1 }
  0xd9   : > { %593 = vst.msk [vmem:[%s938_s13 + $0x14] sm:$0xf] %vm587_vm2, %v560_v5  ;;  %v395_v14 = vadd.f32 %v929_v24, %v394_v12  ;;  %v415_v15 = vadd.f32 %v929_v24, %v414_v13 }
  0xda   : > { %601 = vst.msk [vmem:[%s938_s13 + $0x34] sm:$0xf] %vm587_vm2, %v568_v7  ;;  %vm480_vm8 = vcmp.ge.f32.partialorder %v432_v10, 0.0  ;;  %v512_v16 = vmul.f32 0.2, %v432_v10  ;;  %vm488_vm9 = vcmp.ge.f32.partialorder %v452_v11, 0.0 }
  0xdb   : > { %v520_v17 = vmul.f32 0.2, %v452_v11  ;;  %vm465_vm10 = vcmp.ge.f32.partialorder %v395_v14, 0.0  ;;  %v497_v18 = vmul.f32 0.2, %v395_v14  ;;  %vm473_vm11 = vcmp.ge.f32.partialorder %v415_v15, 0.0 }
  0xdc   : > { %v544_v19 = vsel %vm480_vm8, %v432_v10, %v512_v16  ;;  %v505_v20 = vmul.f32 0.2, %v415_v15 }
  0xdd   : > { %v576_v21 = vpack.c.bf16 %v544_v19, %v544_v19  ;;  %v552_v22 = vsel %vm488_vm9, %v452_v11, %v520_v17  ;;  %v529_v23 = vsel %vm465_vm10, %v395_v14, %v497_v18 }
  0xde   : > { %v584_v25 = vpack.c.bf16 %v552_v22, %v552_v22  ;;  %v561_v26 = vpack.c.bf16 %v529_v23, %v529_v23  ;;  %v537_v27 = vsel %vm473_vm11, %v415_v15, %v505_v20 }
  0xdf   : > { %609 = vst.msk [vmem:[%s938_s13 + $0x54] sm:$0xf] %vm587_vm2, %v576_v21  ;;  %v569_v28 = vpack.c.bf16 %v537_v27, %v537_v27  ;;  %v434_v29 = vpop.f32.mrf.mxu2  ;;  %v454_v30 = vpop.f32.mrf.mxu3 }
  0xe0   : > { %617 = vst.msk [vmem:[%s938_s13 + $0x74] sm:$0xf] %vm587_vm2, %v584_v25  ;;  %v435_v31 = vadd.f32 %v929_v24, %v434_v29  ;;  %v455_v32 = vadd.f32 %v929_v24, %v454_v30  ;;  %v396_v33 = vpop.f32.mrf.mxu0  ;;  %v416_v34 = vpop.f32.mrf.mxu1 }
  0xe1   : > { %594 = vst.msk [vmem:[%s938_s13 + $0x18] sm:$0xf] %vm587_vm2, %v561_v26  ;;  %v397_v35 = vadd.f32 %v929_v24, %v396_v33  ;;  %v417_v36 = vadd.f32 %v929_v24, %v416_v34 }
  0xe2   : > { %602 = vst.msk [vmem:[%s938_s13 + $0x38] sm:$0xf] %vm587_vm2, %v569_v28  ;;  %vm481_vm12 = vcmp.ge.f32.partialorder %v435_v31, 0.0  ;;  %v513_v37 = vmul.f32 0.2, %v435_v31  ;;  %vm489_vm13 = vcmp.ge.f32.partialorder %v455_v32, 0.0 }
  0xe3   : > { %v521_v38 = vmul.f32 0.2, %v455_v32  ;;  %vm466_vm14 = vcmp.ge.f32.partialorder %v397_v35, 0.0  ;;  %v498_v39 = vmul.f32 0.2, %v397_v35  ;;  %vm474_vm15 = vcmp.ge.f32.partialorder %v417_v36, 0.0 }
  0xe4   : > { %v545_v40 = vsel %vm481_vm12, %v435_v31, %v513_v37  ;;  %v506_v41 = vmul.f32 0.2, %v417_v36 }
  0xe5   : > { %v577_v42 = vpack.c.bf16 %v545_v40, %v545_v40  ;;  %v553_v43 = vsel %vm489_vm13, %v455_v32, %v521_v38  ;;  %v530_v44 = vsel %vm466_vm14, %v397_v35, %v498_v39 }
  0xe6   : > { %v585_v45 = vpack.c.bf16 %v553_v43, %v553_v43  ;;  %v562_v46 = vpack.c.bf16 %v530_v44, %v530_v44  ;;  %v538_v47 = vsel %vm474_vm15, %v417_v36, %v506_v41 }
  0xe7   : > { %610 = vst.msk [vmem:[%s938_s13 + $0x58] sm:$0xf] %vm587_vm2, %v577_v42  ;;  %v570_v48 = vpack.c.bf16 %v538_v47, %v538_v47  ;;  %v436_v49 = vpop.f32.mrf.mxu2  ;;  %v456_v50 = vpop.f32.mrf.mxu3 }
  0xe8   : > { %618 = vst.msk [vmem:[%s938_s13 + $0x78] sm:$0xf] %vm587_vm2, %v585_v45  ;;  %v437_v51 = vadd.f32 %v929_v24, %v436_v49  ;;  %v457_v52 = vadd.f32 %v929_v24, %v456_v50 }
  0xe9   : > { %595 = vst.msk [vmem:[%s938_s13 + $0x1c] sm:$0xf] %vm587_vm2, %v562_v46 }
  0xea   : > { %603 = vst.msk [vmem:[%s938_s13 + $0x3c] sm:$0xf] %vm587_vm2, %v570_v48  ;;  %vm482_vm0 = vcmp.ge.f32.partialorder %v437_v51, 0.0  ;;  %v514_v53 = vmul.f32 0.2, %v437_v51  ;;  %vm490_vm1 = vcmp.ge.f32.partialorder %v457_v52, 0.0 }
  0xeb   : > { %v522_v54 = vmul.f32 0.2, %v457_v52 }
  0xec   : > { %v546_v55 = vsel %vm482_vm0, %v437_v51, %v514_v53 }
  0xed   : > { %v578_v56 = vpack.c.bf16 %v546_v55, %v546_v55  ;;  %v554_v57 = vsel %vm490_vm1, %v457_v52, %v522_v54 }
  0xee   : > { %v586_v58 = vpack.c.bf16 %v554_v57, %v554_v57 }
  0xef   : > { %611 = vst.msk [vmem:[%s938_s13 + $0x5c] sm:$0xf] %vm587_vm2, %v578_v56 }
  0xf0   : > { %619 = vst.msk [vmem:[%s938_s13 + $0x7c] sm:$0xf] %vm587_vm2, %v586_v58 }
  0xf1 PF: > { %s13_s12 = sadd.s32 1, %s846_s12  }
  0xf2   : > { %p10_p4 = scmp.ge.s32.totalorder %s13_s12, 4  }
  0xf4   :  { %12 = sbr.rel (!%p10_p4) target bundleno = 1 (0x1), region = 62 }

// kernel: discriminator_forward.4
= control target key start
LH: loop header
LB: loop body
LE: loop exit
PB: predicated region body
PF: predicated region fallthrough
CT: control target
= control target key end

     0   :  { %s698_s12 = smov 0   ;;  %s816_s0 = inlined_call_operand.vmem [shape: bf16[128,256], index: 0, kind: input, shape index: {}]   ;;  %s817_s1 = inlined_call_operand.vmem [shape: bf16[256,32], index: 1, kind: input, shape index: {}]   ;;  %s818_s2 = inlined_call_operand.vmem [shape: f32[1,32], index: 2, kind: input, shape index: {}]   ;;  %s819_s3 = inlined_call_operand.vmem [shape: bf16[128,32], index: 3, kind: output, shape index: {}]  }
   0x1 LB: > { %s512_s13 = sadd.s32 4294967295, %s676_s12   ;;  %p516_p0 = scmp.ge.s32.totalorder %s676_s12, 1  ;;  %s676_s12 = sphi %s698_s12, %s13_s12  }
   0x2   : > { %p139_p1 = scmp.lt.s32.totalorder %s676_s12, 3 }
   0x4   : > { %p140_p2 = pnand %p516_p0, %p139_p1 }
   0x5   : > { %s517_s26 = sshll.u32 (!%p140_p2), %s512_s13, 3 }
   0x6   : > { %143 = sbr.rel (%p140_p2) target bundleno = 209 (0xd1), region = 32  ;;  %p165_p3 = scmp.lt.s32.totalorder (!%p140_p2), %s517_s26, 15 }
   0xb   : > { %v636_v0 = vld [vmem:[%s817_s1 + $0x38] sm:$0xff]  ;;  %v635_v2 = vld [vmem:[%s817_s1 + $0x30] sm:$0xff]  ;;  %v634_v4 = vld [vmem:[%s817_s1 + $0x28] sm:$0xff]  ;;  %s821_s26 = smov (!%p165_p3, %s517_s26), 15  ;;  %vm447_vm1 = vcmask 257024  }
   0xc   : > { %v644_v1 = vld [vmem:[%s817_s1 + $0x78] sm:$0xff]  ;;  %357 = vmatpush.bf16.msra.mxu0 %v636_v0  ;;  %645 = vmatpush.bf16.msra.mxu2 %v636_v0  ;;  %v643_v3 = vld [vmem:[%s817_s1 + $0x70] sm:$0xff]  ;;  %v642_v5 = vld [vmem:[%s817_s1 + $0x68] sm:$0xff]  ;;  %s620_s13 = sshll.u32 %s821_s26, 3  ;;  %s521_s28 = sshll.u32 %s821_s26, 2 }
   0xd   : > { %386 = vmatpush.bf16.msra.mxu1 %v644_v1  ;;  %653 = vmatpush.bf16.msra.mxu3 %v644_v1  ;;  %v633_v6 = vld [vmem:[%s817_s1 + $0x20] sm:$0xff]  ;;  %v632_v8 = vld [vmem:[%s817_s1 + $0x18] sm:$0xff]  ;;  %v631_v10 = vld [vmem:[%s817_s1 + $0x10] sm:$0xff]  ;;  %s751_s18 = scalar_lea.vmem %s816_s0, %s620_s13  ;;  %s788_s4 = scalar_lea.vmem %s819_s3, %s521_s28 }
   0xe   : > { %v641_v7 = vld [vmem:[%s817_s1 + $0x60] sm:$0xff]  ;;  %v640_v9 = vld [vmem:[%s817_s1 + $0x58] sm:$0xff]  ;;  %v639_v11 = vld [vmem:[%s817_s1 + $0x50] sm:$0xff] }
   0xf   : > { %v630_v12 = vld [vmem:[%s817_s1 + $0x8] sm:$0xff]  ;;  %v629_v14 = vld [vmem:[%s817_s1] sm:$0xff]  ;;  %v532_v28 = vld [vmem:[%s751_s18 + $0x10] sm:$0xf] }
  0x10   : > { %358 = vmatpush.bf16.msra.mxu0 %v635_v2  ;;  %646 = vmatpush.bf16.msra.mxu2 %v635_v2  ;;  %v638_v13 = vld [vmem:[%s817_s1 + $0x48] sm:$0xff]  ;;  %v637_v15 = vld [vmem:[%s817_s1 + $0x40] sm:$0xff]  ;;  %v624_v29 = vld [vmem:[%s751_s18 + $0x14] sm:$0xf0] }
  0x11   : > { %387 = vmatpush.bf16.msra.mxu1 %v643_v3  ;;  %654 = vmatpush.bf16.msra.mxu3 %v643_v3  ;;  %v524_v16 = vld [vmem:[%s751_s18] sm:$0xf]  ;;  %v622_v17 = vld [vmem:[%s751_s18 + $0x4] sm:$0xf0]  ;;  %v621_v20 = vld [vmem:[%s751_s18 + $0x4] sm:$0xf]  ;;  %v533_v36 = vor.u32 %v624_v29, %v532_v28 }
  0x12   : > { %v540_v18 = vld [vmem:[%s751_s18 + $0x20] sm:$0xf]  ;;  %v626_v19 = vld [vmem:[%s751_s18 + $0x24] sm:$0xf0]  ;;  %v526_v21 = vld [vmem:[%s751_s18 + $0x8] sm:$0xf0]  ;;  %v525_v24 = vor.u32 %v622_v17, %v524_v16 }
  0x13   : > { %v625_v22 = vld [vmem:[%s751_s18 + $0x24] sm:$0xf]  ;;  %v542_v23 = vld [vmem:[%s751_s18 + $0x28] sm:$0xf0]  ;;  %v541_v25 = vor.u32 %v626_v19, %v540_v18  ;;  %v529_v26 = vor.u32 %v621_v20, %v526_v21  ;;  %v548_v30 = vld [vmem:[%s751_s18 + $0x30] sm:$0xf] }
  0x14   : > { %359 = vmatpush.bf16.msra.mxu0 %v634_v4  ;;  %647 = vmatpush.bf16.msra.mxu2 %v634_v4  ;;  %v545_v27 = vor.u32 %v625_v22, %v542_v23  ;;  %v628_v31 = vld [vmem:[%s751_s18 + $0x34] sm:$0xf0]  ;;  %v623_v32 = vld [vmem:[%s751_s18 + $0x14] sm:$0xf]  ;;  %v534_v33 = vld [vmem:[%s751_s18 + $0x18] sm:$0xf0] }
  0x15   : > { %388 = vmatpush.bf16.msra.mxu1 %v642_v5  ;;  %655 = vmatpush.bf16.msra.mxu3 %v642_v5  ;;  %v627_v34 = vld [vmem:[%s751_s18 + $0x34] sm:$0xf]  ;;  %v550_v35 = vld [vmem:[%s751_s18 + $0x38] sm:$0xf0]  ;;  %v549_v37 = vor.u32 %v628_v31, %v548_v30  ;;  %v537_v38 = vor.u32 %v623_v32, %v534_v33  ;;  %v781_v40 = vld [vmem:[%s818_s2] ss:$0 sm:$0xff] }
  0x16   : > { %v553_v39 = vor.u32 %v627_v34, %v550_v35 }
  0x18   : > { %360 = vmatpush.bf16.msra.mxu0 %v633_v6  ;;  %648 = vmatpush.bf16.msra.mxu2 %v633_v6 }
  0x19   : > { %389 = vmatpush.bf16.msra.mxu1 %v641_v7  ;;  %656 = vmatpush.bf16.msra.mxu3 %v641_v7 }
  0x1c   : > { %361 = vmatpush.bf16.msra.mxu0 %v632_v8  ;;  %649 = vmatpush.bf16.msra.mxu2 %v632_v8 }
  0x1d   : > { %390 = vmatpush.bf16.msra.mxu1 %v640_v9  ;;  %657 = vmatpush.bf16.msra.mxu3 %v640_v9 }
  0x20   : > { %362 = vmatpush.bf16.msra.mxu0 %v631_v10  ;;  %650 = vmatpush.bf16.msra.mxu2 %v631_v10 }
  0x21   : > { %391 = vmatpush.bf16.msra.mxu1 %v639_v11  ;;  %658 = vmatpush.bf16.msra.mxu3 %v639_v11 }
  0x24   : > { %363 = vmatpush.bf16.msra.mxu0 %v630_v12  ;;  %651 = vmatpush.bf16.msra.mxu2 %v630_v12 }
  0x25   : > { %392 = vmatpush.bf16.msra.mxu1 %v638_v13  ;;  %659 = vmatpush.bf16.msra.mxu3 %v638_v13 }
  0x28   : > { %364 = vmatpush.bf16.msra.mxu0 %v629_v14  ;;  %652 = vmatpush.bf16.msra.mxu2 %v629_v14 }
  0x29   : > { %393 = vmatpush.bf16.msra.mxu1 %v637_v15  ;;  %660 = vmatpush.bf16.msra.mxu3 %v637_v15 }
  0x2b   : > { %365 = vmatmul.bf16.vlgmr.msra.gmra.mxu0 %v525_v24  ;;  %375 = vmatmul.bf16.vlgmr.msra.gmra.mxu2 %v541_v25 }
  0x2c   : > { %394 = vmatmul.bf16.vlgmr.msra.gmra.mxu1 %v529_v26  ;;  %404 = vmatmul.bf16.vlgmr.msra.gmra.mxu3 %v545_v27 }
  0x3b   : > { %370 = vmatmul.bf16.gmra.mxu0 %v533_v36  ;;  %380 = vmatmul.bf16.gmra.mxu2 %v549_v37 }
  0x3c   : > { %399 = vmatmul.bf16.gmra.mxu1 %v537_v38  ;;  %409 = vmatmul.bf16.gmra.mxu3 %v553_v39 }
  0xa8   : > { %v366_v41 = vpop.f32.mrf.mxu0 }
  0xa9   : > { %v367_v42 = vadd.f32 %v781_v40, %v366_v41  ;;  %v395_v43 = vpop.f32.mrf.mxu1 }
  0xab   : > { %v396_v44 = vadd.f32 %v395_v43, %v367_v42 }
  0xad   : > { %vm415_vm0 = vcmp.ge.f32.partialorder %v396_v44, 0.0  ;;  %v423_v45 = vmul.f32 0.2, %v396_v44 }
  0xae   : > { %v376_v46 = vpop.f32.mrf.mxu2 }
  0xaf   : > { %v431_v47 = vsel %vm415_vm0, %v396_v44, %v423_v45  ;;  %v377_v48 = vadd.f32 %v781_v40, %v376_v46  ;;  %v405_v49 = vpop.f32.mrf.mxu3 }
  0xb0   : > { %v439_v50 = vpack.c.bf16 %v431_v47, %v431_v47  ;;  %v368_v51 = vpop.f32.mrf.mxu0 }
  0xb1   : > { %v406_v52 = vadd.f32 %v405_v49, %v377_v48  ;;  %v369_v53 = vadd.f32 %v781_v40, %v368_v51  ;;  %v397_v54 = vpop.f32.mrf.mxu1 }
  0xb2   : > { %448 = vst.msk [vmem:[%s788_s4] sm:$0xf] %vm447_vm1, %v439_v50 }
  0xb3   : > { %vm419_vm2 = vcmp.ge.f32.partialorder %v406_v52, 0.0  ;;  %v427_v55 = vmul.f32 0.2, %v406_v52  ;;  %v398_v56 = vadd.f32 %v397_v54, %v369_v53 }
  0xb5   : > { %v435_v57 = vsel %vm419_vm2, %v406_v52, %v427_v55  ;;  %vm416_vm3 = vcmp.ge.f32.partialorder %v398_v56, 0.0  ;;  %v424_v58 = vmul.f32 0.2, %v398_v56 }
  0xb6   : > { %v443_v59 = vpack.c.bf16 %v435_v57, %v435_v57  ;;  %v378_v60 = vpop.f32.mrf.mxu2 }
  0xb7   : > { %v432_v61 = vsel %vm416_vm3, %v398_v56, %v424_v58  ;;  %v379_v62 = vadd.f32 %v781_v40, %v378_v60  ;;  %v407_v63 = vpop.f32.mrf.mxu3 }
  0xb8   : > { %452 = vst.msk [vmem:[%s788_s4 + $0x10] sm:$0xf] %vm447_vm1, %v443_v59  ;;  %v440_v0 = vpack.c.bf16 %v432_v61, %v432_v61  ;;  %v371_v1 = vpop.f32.mrf.mxu0 }
  0xb9   : > { %v408_v2 = vadd.f32 %v407_v63, %v379_v62  ;;  %v372_v3 = vadd.f32 %v781_v40, %v371_v1  ;;  %v400_v4 = vpop.f32.mrf.mxu1 }
  0xba   : > { %449 = vst.msk [vmem:[%s788_s4 + $0x4] sm:$0xf] %vm447_vm1, %v440_v0 }
  0xbb   : > { %vm420_vm4 = vcmp.ge.f32.partialorder %v408_v2, 0.0  ;;  %v428_v5 = vmul.f32 0.2, %v408_v2  ;;  %v401_v6 = vadd.f32 %v400_v4, %v372_v3 }
  0xbd   : > { %v436_v7 = vsel %vm420_vm4, %v408_v2, %v428_v5  ;;  %vm417_vm5 = vcmp.ge.f32.partialorder %v401_v6, 0.0  ;;  %v425_v8 = vmul.f32 0.2, %v401_v6 }
  0xbe   : > { %v444_v9 = vpack.c.bf16 %v436_v7, %v436_v7  ;;  %v381_v10 = vpop.f32.mrf.mxu2 }
  0xbf   : > { %v433_v11 = vsel %vm417_vm5, %v401_v6, %v425_v8  ;;  %v382_v12 = vadd.f32 %v781_v40, %v381_v10  ;;  %v410_v13 = vpop.f32.mrf.mxu3 }
  0xc0   : > { %453 = vst.msk [vmem:[%s788_s4 + $0x14] sm:$0xf] %vm447_vm1, %v444_v9  ;;  %v441_v14 = vpack.c.bf16 %v433_v11, %v433_v11  ;;  %v373_v15 = vpop.f32.mrf.mxu0 }
  0xc1   : > { %v411_v16 = vadd.f32 %v410_v13, %v382_v12  ;;  %v374_v17 = vadd.f32 %v781_v40, %v373_v15  ;;  %v402_v18 = vpop.f32.mrf.mxu1 }
  0xc2   : > { %450 = vst.msk [vmem:[%s788_s4 + $0x8] sm:$0xf] %vm447_vm1, %v441_v14 }
  0xc3   : > { %vm421_vm6 = vcmp.ge.f32.partialorder %v411_v16, 0.0  ;;  %v429_v19 = vmul.f32 0.2, %v411_v16  ;;  %v403_v20 = vadd.f32 %v402_v18, %v374_v17 }
  0xc5   : > { %v437_v21 = vsel %vm421_vm6, %v411_v16, %v429_v19  ;;  %vm418_vm7 = vcmp.ge.f32.partialorder %v403_v20, 0.0  ;;  %v426_v22 = vmul.f32 0.2, %v403_v20 }
  0xc6   : > { %v445_v23 = vpack.c.bf16 %v437_v21, %v437_v21  ;;  %v383_v24 = vpop.f32.mrf.mxu2 }
  0xc7   : > { %v434_v25 = vsel %vm418_vm7, %v403_v20, %v426_v22  ;;  %v384_v26 = vadd.f32 %v781_v40, %v383_v24  ;;  %v412_v28 = vpop.f32.mrf.mxu3 }
  0xc8   : > { %454 = vst.msk [vmem:[%s788_s4 + $0x18] sm:$0xf] %vm447_vm1, %v445_v23  ;;  %v442_v27 = vpack.c.bf16 %v434_v25, %v434_v25 }
  0xc9   : > { %v413_v29 = vadd.f32 %v412_v28, %v384_v26 }
  0xca   : > { %451 = vst.msk [vmem:[%s788_s4 + $0xc] sm:$0xf] %vm447_vm1, %v442_v27 }
  0xcb   : > { %vm422_vm8 = vcmp.ge.f32.partialorder %v413_v29, 0.0  ;;  %v430_v30 = vmul.f32 0.2, %v413_v29 }
  0xcd   : > { %v438_v31 = vsel %vm422_vm8, %v413_v29, %v430_v30 }
  0xce   : > { %v446_v32 = vpack.c.bf16 %v438_v31, %v438_v31 }
  0xd0   : > { %455 = vst.msk [vmem:[%s788_s4 + $0x1c] sm:$0xf] %vm447_vm1, %v446_v32 }
  0xd1 PF: > { %s13_s12 = sadd.s32 1, %s676_s12  }
  0xd2   : > { %p10_p4 = scmp.ge.s32.totalorder %s13_s12, 4  }
  0xd4   :  { %12 = sbr.rel (!%p10_p4) target bundleno = 1 (0x1), region = 62 }

// kernel: discriminator_forward.5
= control target key start
LH: loop header
LB: loop body
LE: loop exit
PB: predicated region body
PF: predicated region fallthrough
CT: control target
= control target key end

     0   :  { %s814_s12 = smov 0   ;;  %s934_s0 = inlined_call_operand.vmem [shape: bf16[32,512], index: 0, kind: input, shape index: {}]   ;;  %s935_s1 = inlined_call_operand.vmem [shape: bf16[512,64], index: 1, kind: input, shape index: {}]   ;;  %s936_s2 = inlined_call_operand.vmem [shape: f32[1,64], index: 2, kind: input, shape index: {}]   ;;  %s937_s3 = inlined_call_operand.vmem [shape: bf16[32,64], index: 3, kind: output, shape index: {}]  }
   0x1 LB: > { %s584_s13 = sadd.s32 4294967295, %s792_s12   ;;  %p588_p0 = scmp.ge.s32.totalorder %s792_s12, 1  ;;  %s792_s12 = sphi %s814_s12, %s13_s12  }
   0x2   : > { %p139_p1 = scmp.lt.s32.totalorder %s792_s12, 3 }
   0x4   : > { %p140_p2 = pnand %p588_p0, %p139_p1 }
   0x5   : > { %s589_s11 = sshll.u32 (!%p140_p2), %s584_s13, 1 }
   0x6   : > { %143 = sbr.rel (%p140_p2) target bundleno = 195 (0xc3), region = 32  ;;  %p165_p3 = scmp.lt.s32.totalorder (!%p140_p2), %s589_s11, 3 }
   0xb   : > { %v752_v0 = vld [vmem:[%s935_s1 + $0x38] sm:$0xff]  ;;  %v751_v4 = vld [vmem:[%s935_s1 + $0x30] sm:$0xff]  ;;  %v750_v8 = vld [vmem:[%s935_s1 + $0x28] sm:$0xff]  ;;  %s939_s11 = smov (!%p165_p3, %s589_s11), 3  ;;  %vm525_vm1 = vcmask 519168  }
   0xc   : > { %v760_v1 = vld [vmem:[%s935_s1 + $0x78] sm:$0xff]  ;;  %461 = vmatpush.bf16.msra.mxu0 %v752_v0  ;;  %v759_v5 = vld [vmem:[%s935_s1 + $0x70] sm:$0xff]  ;;  %v758_v9 = vld [vmem:[%s935_s1 + $0x68] sm:$0xff]  ;;  %s740_s10 = sshll.u32 %s939_s11, 4  ;;  %s593_s7 = sshll.u32 %s939_s11, 2 }
   0xd   : > { %v768_v2 = vld [vmem:[%s935_s1 + $0xb8] sm:$0xff]  ;;  %475 = vmatpush.bf16.msra.mxu1 %v760_v1  ;;  %v767_v6 = vld [vmem:[%s935_s1 + $0xb0] sm:$0xff]  ;;  %v766_v10 = vld [vmem:[%s935_s1 + $0xa8] sm:$0xff]  ;;  %s169_s20 = scalar_lea.vmem %s934_s0, %s740_s10  ;;  %s175_s10 = scalar_lea.vmem %s937_s3, %s593_s7 }
   0xe   : > { %v776_v3 = vld [vmem:[%s935_s1 + $0xf8] sm:$0xff]  ;;  %489 = vmatpush.bf16.msra.mxu2 %v768_v2  ;;  %v775_v7 = vld [vmem:[%s935_s1 + $0xf0] sm:$0xff]  ;;  %v774_v11 = vld [vmem:[%s935_s1 + $0xe8] sm:$0xff] }
   0xf   : > { %503 = vmatpush.bf16.msra.mxu3 %v776_v3  ;;  %v749_v12 = vld [vmem:[%s935_s1 + $0x20] sm:$0xff]  ;;  %v748_v16 = vld [vmem:[%s935_s1 + $0x18] sm:$0xff]  ;;  %v747_v20 = vld [vmem:[%s935_s1 + $0x10] sm:$0xff] }
  0x10   : > { %462 = vmatpush.bf16.msra.mxu0 %v751_v4  ;;  %v757_v13 = vld [vmem:[%s935_s1 + $0x60] sm:$0xff]  ;;  %v756_v17 = vld [vmem:[%s935_s1 + $0x58] sm:$0xff]  ;;  %v755_v21 = vld [vmem:[%s935_s1 + $0x50] sm:$0xff] }
  0x11   : > { %476 = vmatpush.bf16.msra.mxu1 %v759_v5  ;;  %v765_v14 = vld [vmem:[%s935_s1 + $0xa0] sm:$0xff]  ;;  %v764_v18 = vld [vmem:[%s935_s1 + $0x98] sm:$0xff]  ;;  %v763_v22 = vld [vmem:[%s935_s1 + $0x90] sm:$0xff] }
  0x12   : > { %490 = vmatpush.bf16.msra.mxu2 %v767_v6  ;;  %v773_v15 = vld [vmem:[%s935_s1 + $0xe0] sm:$0xff]  ;;  %v772_v19 = vld [vmem:[%s935_s1 + $0xd8] sm:$0xff]  ;;  %v771_v23 = vld [vmem:[%s935_s1 + $0xd0] sm:$0xff] }
  0x13   : > { %504 = vmatpush.bf16.msra.mxu3 %v775_v7  ;;  %v746_v24 = vld [vmem:[%s935_s1 + $0x8] sm:$0xff]  ;;  %v745_v28 = vld [vmem:[%s935_s1] sm:$0xff]  ;;  %v743_v33 = vld [vmem:[%s169_s20 + $0xc] sm:$0xf0] }
  0x14   : > { %463 = vmatpush.bf16.msra.mxu0 %v750_v8  ;;  %v754_v25 = vld [vmem:[%s935_s1 + $0x48] sm:$0xff]  ;;  %v753_v29 = vld [vmem:[%s935_s1 + $0x40] sm:$0xff]  ;;  %v598_v35 = vld [vmem:[%s169_s20 + $0x10] sm:$0xf0] }
  0x15   : > { %477 = vmatpush.bf16.msra.mxu1 %v758_v9  ;;  %v762_v26 = vld [vmem:[%s935_s1 + $0x88] sm:$0xff]  ;;  %v761_v30 = vld [vmem:[%s935_s1 + $0x80] sm:$0xff]  ;;  %v744_v37 = vld [vmem:[%s169_s20 + $0x14] sm:$0xf0] }
  0x16   : > { %491 = vmatpush.bf16.msra.mxu2 %v766_v10  ;;  %v770_v27 = vld [vmem:[%s935_s1 + $0xc8] sm:$0xff]  ;;  %v769_v31 = vld [vmem:[%s935_s1 + $0xc0] sm:$0xff]  ;;  %v606_v39 = vld [vmem:[%s169_s20 + $0x18] sm:$0xf0] }
  0x17   : > { %505 = vmatpush.bf16.msra.mxu3 %v774_v11  ;;  %v596_v32 = vld [vmem:[%s169_s20] sm:$0xf]  ;;  %v741_v34 = vld [vmem:[%s169_s20 + $0x4] sm:$0xf]  ;;  %v604_v36 = vld [vmem:[%s169_s20 + $0x8] sm:$0xf] }
  0x18   : > { %464 = vmatpush.bf16.msra.mxu0 %v749_v12  ;;  %v742_v38 = vld [vmem:[%s169_s20 + $0xc] sm:$0xf]  ;;  %v597_v40 = vor.u32 %v743_v33, %v596_v32  ;;  %v601_v41 = vor.u32 %v741_v34, %v598_v35  ;;  %v605_v42 = vor.u32 %v744_v37, %v604_v36  ;;  %v785_v44 = vld [vmem:[%s936_s2] ss:$0 sm:$0xff] }
  0x19   : > { %478 = vmatpush.bf16.msra.mxu1 %v757_v13  ;;  %v609_v43 = vor.u32 %v742_v38, %v606_v39 }
  0x1a   : > { %492 = vmatpush.bf16.msra.mxu2 %v765_v14 }
  0x1b   : > { %506 = vmatpush.bf16.msra.mxu3 %v773_v15 }
  0x1c   : > { %465 = vmatpush.bf16.msra.mxu0 %v748_v16 }
  0x1d   : > { %479 = vmatpush.bf16.msra.mxu1 %v756_v17 }
  0x1e   : > { %493 = vmatpush.bf16.msra.mxu2 %v764_v18 }
  0x1f   : > { %507 = vmatpush.bf16.msra.mxu3 %v772_v19 }
  0x20   : > { %466 = vmatpush.bf16.msra.mxu0 %v747_v20 }
  0x21   : > { %480 = vmatpush.bf16.msra.mxu1 %v755_v21 }
  0x22   : > { %494 = vmatpush.bf16.msra.mxu2 %v763_v22 }
  0x23   : > { %508 = vmatpush.bf16.msra.mxu3 %v771_v23 }
  0x24   : > { %467 = vmatpush.bf16.msra.mxu0 %v746_v24 }
  0x25   : > { %481 = vmatpush.bf16.msra.mxu1 %v754_v25 }
  0x26   : > { %495 = vmatpush.bf16.msra.mxu2 %v762_v26 }
  0x27   : > { %509 = vmatpush.bf16.msra.mxu3 %v770_v27 }
  0x28   : > { %468 = vmatpush.bf16.msra.mxu0 %v745_v28 }
  0x29   : > { %482 = vmatpush.bf16.msra.mxu1 %v753_v29 }
  0x2a   : > { %496 = vmatpush.bf16.msra.mxu2 %v761_v30 }
  0x2b   : > { %510 = vmatpush.bf16.msra.mxu3 %v769_v31  ;;  %469 = vmatmul.bf16.vlgmr.msra.gmra.mxu0 %v597_v40 }
  0x2c   : > { %483 = vmatmul.bf16.vlgmr.msra.gmra.mxu1 %v601_v41 }
  0x2d   : > { %497 = vmatmul.bf16.vlgmr.msra.gmra.mxu2 %v605_v42 }
  0x2e   : > { %511 = vmatmul.bf16.vlgmr.msra.gmra.mxu3 %v609_v43 }
  0xa8   : > { %v470_v45 = vpop.f32.mrf.mxu0 }
  0xa9   : > { %v471_v46 = vadd.f32 %v785_v44, %v470_v45  ;;  %v484_v47 = vpop.f32.mrf.mxu1 }
  0xab   : > { %v485_v48 = vadd.f32 %v484_v47, %v471_v46 }
  0xb0   : > { %v498_v49 = vpop.f32.mrf.mxu2  ;;  %v472_v52 = vpop.f32.mrf.mxu0 }
  0xb1   : > { %v512_v50 = vpop.f32.mrf.mxu3  ;;  %v499_v51 = vadd.f32 %v498_v49, %v485_v48  ;;  %v473_v54 = vadd.f32 %v785_v44, %v472_v52  ;;  %v486_v56 = vpop.f32.mrf.mxu1 }
  0xb3   : > { %v513_v53 = vadd.f32 %v512_v50, %v499_v51  ;;  %v487_v58 = vadd.f32 %v486_v56, %v473_v54 }
  0xb5   : > { %vm517_vm0 = vcmp.ge.f32.partialorder %v513_v53, 0.0  ;;  %v519_v55 = vmul.f32 0.2, %v513_v53 }
  0xb7   : > { %v521_v57 = vsel %vm517_vm0, %v513_v53, %v519_v55 }
  0xb8   : > { %v523_v59 = vpack.c.bf16 %v521_v57, %v521_v57  ;;  %v500_v60 = vpop.f32.mrf.mxu2 }
  0xb9   : > { %v501_v61 = vadd.f32 %v500_v60, %v487_v58  ;;  %v514_v62 = vpop.f32.mrf.mxu3 }
  0xba   : > { %526 = vst.msk [vmem:[%s175_s10] sm:$0xf] %vm525_vm1, %v523_v59 }
  0xbb   : > { %v515_v63 = vadd.f32 %v514_v62, %v501_v61 }
  0xbd   : > { %vm518_vm2 = vcmp.ge.f32.partialorder %v515_v63, 0.0  ;;  %v520_v0 = vmul.f32 0.2, %v515_v63 }
  0xbf   : > { %v522_v1 = vsel %vm518_vm2, %v515_v63, %v520_v0 }
  0xc0   : > { %v524_v2 = vpack.c.bf16 %v522_v1, %v522_v1 }
  0xc2   : > { %527 = vst.msk [vmem:[%s175_s10 + $0x4] sm:$0xf] %vm525_vm1, %v524_v2 }
  0xc3 PF: > { %s13_s12 = sadd.s32 1, %s792_s12  }
  0xc4   : > { %p10_p4 = scmp.ge.s32.totalorder %s13_s12, 4  }
  0xc6   :  { %12 = sbr.rel (!%p10_p4) target bundleno = 1 (0x1), region = 62 }

</bundles_post_ra>
